<compile_context>
chip_gen: v6e
topology: v6e:2x2x1
jax: 0.10.0
libtpu: 0.0.40
codegen_flags: <defaults>
</compile_context>

<pallas_src>
import functools

import jax
import jax.numpy as jnp
from jax.experimental import pallas as pl
from jax.experimental.pallas import tpu as pltpu


# ----------------------------------------------------------------------------
# small helpers
# ----------------------------------------------------------------------------
def _pick_tile(n, pref, align):
    """Largest tile <= pref that divides n and is `align`-aligned; else full n."""
    t = min(pref, n)
    t -= t % align
    while t >= align and n % t:
        t -= align
    return t if t >= align else n


def _vmem_limit_bytes(block_bytes):
    """Scoped VMEM limit derived from the actual blocks, capped below the
    physical per-core VMEM (64 MiB on v7x) minus headroom."""
    try:
        cap = pltpu.get_tpu_info().vmem_capacity_bytes
    except Exception:                 # conservative fallback = v7x physical
        cap = 64 * 2 ** 20
    cap -= 8 * 2 ** 20                # headroom for compiler scratch
    want = block_bytes + 4 * 2 ** 20  # blocks already include double-buffering
    return int(max(16 * 2 ** 20, min(cap, want)))


# ----------------------------------------------------------------------------
# Kernel 1 (prologue, once per layer): per-node projections.
#   XS    = X @ W_self      -> f32   (seeds the f32 accumulator)
#   XW[r] = X @ W_rel[r]    -> compute dtype (feeds the MXU in kernel 2)
# ----------------------------------------------------------------------------
def _make_proj_kernel(num_rels):
    R = num_rels

    def kernel(x_ref, wall_ref, xs_ref, xw_ref):
        x = x_ref[...]
        xs_ref[...] = jnp.dot(x, wall_ref[0],
                              preferred_element_type=jnp.float32)
        for r in range(R):            # R is small and static
            xw_ref[r] = jnp.dot(
                x, wall_ref[r + 1],
                preferred_element_type=jnp.float32).astype(xw_ref.dtype)

    return kernel


# ----------------------------------------------------------------------------
# Kernel 2 (main): dense scatter-sum aggregation + self loop + relu.
#   grid = (dst tiles [parallel], src tiles [arbitrary, last]).
#   acc(k==0) = XS;  acc += A[r] @ XW[r];  out(k==last) = relu(acc).
# ----------------------------------------------------------------------------
def _make_agg_kernel(num_rels, compute_dtype):
    R = num_rels
    cd = jnp.dtype(compute_dtype)

    def kernel(adj_ref, xw_ref, xs_ref, out_ref, acc_ref):
        k = pl.program_id(1)

        @pl.when(k == 0)
        def _():
            acc_ref[...] = xs_ref[...]          # self-loop term (f32)

        # Basis combine already hoisted -> body is just dot + add per relation.
        for r in range(R):
            a_r = adj_ref[r].astype(jnp.float32)   # int8 counts -> f32 (exact)
            if cd != jnp.dtype(jnp.float32):
                a_r = a_r.astype(cd)               # -> bf16 operand for the MXU
            acc_ref[...] += jnp.dot(a_r, xw_ref[r],
                                    preferred_element_type=jnp.float32)

        @pl.when(k == pl.num_programs(1) - 1)
        def _():
            # bias=None, activation=relu in the module
            out_ref[...] = jnp.maximum(acc_ref[...], 0.0).astype(out_ref.dtype)

    return kernel


# ----------------------------------------------------------------------------
# One RGCNBasisLayer forward.
# ----------------------------------------------------------------------------
def rgcn_layer(x, w_comp, basis, adj, w_self, *,
               compute_dtype=jnp.bfloat16, out_dtype=jnp.float32,
               tile_m=None, tile_k=None, tile_p=None):
    """h = relu(X @ W_self + sum_r A[r] @ (X @ W_rel[r])),
       W_rel[r] = sum_b w_comp[r, b] * basis[b].

    x:      (N, D)    node features
    w_comp: (R, B)    basis coefficients
    basis:  (B, D, D) basis weights
    adj:    (R, N, N) dense per-relation adjacency counts (int8, counts <= 127)
    w_self: (D, D)    self-loop weight
    """
    N, D = x.shape
    R, B = w_comp.shape
    assert basis.shape == (B, D, D)
    assert adj.shape == (R, N, N)
    assert w_self.shape == (D, D)
    assert N % 8 == 0, "node count must be a multiple of 8 (sublane tiling)"

    cd = jnp.dtype(compute_dtype)
    od = jnp.dtype(out_dtype)

    # dst tiles 32-aligned (covers int8/bf16/f32 sublane packing), src tiles
    # 128-lane aligned, projection tiles 32-aligned; each falls back to the
    # full dimension when N is small (legal per the (8,128) tiling rules).
    tm = tile_m or _pick_tile(N, 256, 32)
    tk = tile_k or _pick_tile(N, 512, 128)
    tp = tile_p or _pick_tile(N, 512, 32)

    # ---- (0) basis combination (R*B*D^2 flops, tiny) in plain JAX ----------
    w_rel = jnp.einsum('rb,bde->rde', w_comp.astype(jnp.float32),
                       basis.astype(jnp.float32))
    w_all = jnp.concatenate([w_self.astype(jnp.float32)[None], w_rel],
                            axis=0).astype(cd)               # (R+1, D, D)
    x_cd = x.astype(cd)

    # ---- (1) projection kernel (once per layer) -----------------------------
    proj_block_bytes = (2 * tp * D * cd.itemsize              # X tile
                        + 2 * (R + 1) * D * D * cd.itemsize   # resident weights
                        + 2 * tp * D * 4                      # XS tile out
                        + 2 * R * tp * D * cd.itemsize)       # XW tile out
    proj_cost = pl.CostEstimate(
        flops=int(2 * N * D * D * (R + 1)), transcendentals=0,
        bytes_accessed=int(N * D * cd.itemsize + (R + 1) * D * D * cd.itemsize
                           + N * D * 4 + R * N * D * cd.itemsize))
    xs, xw = pl.pallas_call(
        _make_proj_kernel(R),
        out_shape=(jax.ShapeDtypeStruct((N, D), jnp.float32),    # XS
                   jax.ShapeDtypeStruct((R, N, D), cd)),          # XW
        grid=(N // tp,),
        in_specs=[
            pl.BlockSpec((tp, D), lambda i: (i, 0)),              # X rows
            pl.BlockSpec((R + 1, D, D), lambda i: (0, 0, 0)),     # weights
        ],
        out_specs=(
            pl.BlockSpec((tp, D), lambda i: (i, 0)),
            pl.BlockSpec((R, tp, D), lambda i: (0, i, 0)),
        ),
        compiler_params=pltpu.CompilerParams(
            dimension_semantics=("parallel",),
            vmem_limit_bytes=_vmem_limit_bytes(proj_block_bytes)),
        cost_estimate=proj_cost,
    )(x_cd, w_all)

    # ---- (2) aggregation kernel ---------------------------------------------
    adj_bytes = jnp.dtype(adj.dtype).itemsize
    agg_block_bytes = (2 * R * tm * tk * adj_bytes        # A tile (dominant)
                       + 2 * R * tk * D * cd.itemsize     # XW src tile
                       + 2 * tm * D * 4                   # XS dst tile (f32)
                       + 2 * tm * D * od.itemsize         # output tile
                       + tm * D * 4)                      # f32 accumulator
    agg_cost = pl.CostEstimate(
        flops=int(2 * R * N * N * D), transcendentals=0,
        bytes_accessed=int(R * N * N * adj_bytes + R * N * D * cd.itemsize
                           + N * D * 4 + N * D * od.itemsize))
    h = pl.pallas_call(
        _make_agg_kernel(R, cd),
        out_shape=jax.ShapeDtypeStruct((N, D), od),
        grid=(N // tm, N // tk),                     # (dst tiles, src tiles)
        in_specs=[
            pl.BlockSpec((R, tm, tk), lambda i, k: (0, i, k)),    # A
            pl.BlockSpec((R, tk, D), lambda i, k: (0, k, 0)),     # XW (src rows)
            pl.BlockSpec((tm, D), lambda i, k: (i, 0)),           # XS (dst rows)
        ],
        out_specs=pl.BlockSpec((tm, D), lambda i, k: (i, 0)),
        scratch_shapes=[pltpu.VMEM((tm, D), jnp.float32)],
        compiler_params=pltpu.CompilerParams(
            dimension_semantics=("parallel", "arbitrary"),
            vmem_limit_bytes=_vmem_limit_bytes(agg_block_bytes)),
        cost_estimate=agg_cost,
    )(adj, xw, xs)
    return h


# ----------------------------------------------------------------------------
# Parameter init (deterministic xavier-uniform with relu gain, as in the module)
# ----------------------------------------------------------------------------
def _xavier(key, shape, fan_in, fan_out, gain=2.0 ** 0.5):
    bound = gain * (6.0 / (fan_in + fan_out)) ** 0.5
    return jax.random.uniform(key, shape, jnp.float32, -bound, bound)


def init_rgcn_params(key, *, num_nodes, inp_dim, emb_dim, num_rels, num_bases,
                     num_gcn_layers):
    D = inp_dim + emb_dim
    keys = jax.random.split(key, 1 + 3 * num_gcn_layers)
    params = {
        "embed": _xavier(keys[0], (num_nodes, emb_dim), num_nodes, emb_dim),
        "layers": [],
    }
    for l in range(num_gcn_layers):
        k_w, k_c, k_s = keys[1 + 3 * l: 4 + 3 * l]
        params["layers"].append({
            "weight": _xavier(k_w, (num_bases, D, D), D * D, num_bases * D),
            "w_comp": _xavier(k_c, (num_rels, num_bases), num_bases, num_rels),
            "self_loop": _xavier(k_s, (D, D), D, D),
        })
    return params


# ----------------------------------------------------------------------------
# Forward pass (glue in plain JAX, hot path in the Pallas kernels)
# ----------------------------------------------------------------------------
@functools.partial(jax.jit, static_argnames=("compute_dtype",))
def rgcn_forward(params, feat, node_idx, adj, compute_dtype=jnp.bfloat16):
    # input-layer features: cat([feat, embed[idx]])   (add_transe_emb=True)
    h = jnp.concatenate([feat, params["embed"][node_idx]], axis=1)
    cd = jnp.dtype(compute_dtype)
    n_layers = len(params["layers"])
    for li, layer in enumerate(params["layers"]):
        last = li == n_layers - 1
        # intermediate layers write back in the compute dtype (halved HBM
        # writeback; the next layer re-casts anyway); final layer stays f32.
        od = jnp.float32 if (last or cd == jnp.dtype(jnp.float32)) else cd
        h = rgcn_layer(h, layer["w_comp"], layer["weight"], adj,
                       layer["self_loop"], compute_dtype=cd, out_dtype=od)
    return h.astype(jnp.float32)        # == g.ndata.pop('h')


# ----------------------------------------------------------------------------
# Pure-JAX edge-list reference (DGL message/aggregate semantics).
# With compute_dtype=float32 this is exactly the PyTorch module's math
# (basis-first combination is algebraically identical); with bfloat16 it
# applies the same operand-rounding policy as the kernel so the check isolates
# kernel correctness.
# ----------------------------------------------------------------------------
def rgcn_forward_ref(params, feat, node_idx, src, dst, etype,
                     compute_dtype=jnp.float32):
    cd = jnp.dtype(compute_dtype)
    h = jnp.concatenate([feat, params["embed"][node_idx]], axis=1)
    N, D = h.shape
    n_layers = len(params["layers"])
    for li, layer in enumerate(params["layers"]):
        x_cd = h.astype(cd)
        w_rel = jnp.einsum('rb,bde->rde', layer["w_comp"],
                           layer["weight"]).astype(cd)
        xw = jnp.einsum('nd,rde->rne', x_cd, w_rel,
                        preferred_element_type=jnp.float32).astype(cd)
        # per-edge message msg_e = x[src_e] @ W_rel[type_e]; SumAggregator
        msg = xw[etype, src].astype(jnp.float32)
        agg = jnp.zeros((N, D), jnp.float32).at[dst].add(msg)
        xs = jnp.dot(x_cd, layer["self_loop"].astype(cd),
                     preferred_element_type=jnp.float32)
        hf = jax.nn.relu(agg + xs)
        last = li == n_layers - 1
        # mirror the kernel's intermediate-layer writeback dtype
        h = hf if (last or cd == jnp.dtype(jnp.float32)) \
            else hf.astype(cd).astype(jnp.float32)
    return h


if __name__ == "__main__":
    # Small deterministic config
    N = 64            # graph nodes (== embedding table size here, idx = arange)
    INP_DIM = 16
    EMB_DIM = 16
    D = INP_DIM + EMB_DIM
    NUM_RELS = 4      # aug_num_rels
    NUM_BASES = 2
    NUM_LAYERS = 2    # num_gcn_layers (1 input + 1 hidden)
    E = 128           # edges

    key = jax.random.PRNGKey(0)
    k_par, k_feat, k_src, k_dst, k_typ = jax.random.split(key, 5)

    params = init_rgcn_params(
        k_par, num_nodes=N, inp_dim=INP_DIM, emb_dim=EMB_DIM,
        num_rels=NUM_RELS, num_bases=NUM_BASES, num_gcn_layers=NUM_LAYERS)

    feat = jax.random.normal(k_feat, (N, INP_DIM), jnp.float32)
    node_idx = jnp.arange(N, dtype=jnp.int32)

    # synthetic graph: every node has at least one in-edge
    src = jax.random.randint(k_src, (E,), 0, N)
    dst = jnp.concatenate(
        [jnp.arange(N, dtype=jnp.int32),
         jax.random.randint(k_dst, (E - N,), 0, N)])
    etype = jax.random.randint(k_typ, (E,), 0, NUM_RELS)

    # dense per-relation adjacency: adj[r, v, u] = #edges u -> v of relation r
    adj_counts = jnp.zeros((NUM_RELS, N, N), jnp.int32).at[etype, dst, src].add(1)
    assert int(adj_counts.max()) <= 127, "int8 adjacency requires counts <= 127"
    adj = adj_counts.astype(jnp.int8)   # halves the dominant HBM stream

    # (a) f32 operands: module-exact math, tight check vs the edge-list ref
    h32 = jax.block_until_ready(
        rgcn_forward(params, feat, node_idx, adj, compute_dtype=jnp.float32))
    ref32 = rgcn_forward_ref(params, feat, node_idx, src, dst, etype,
                             compute_dtype=jnp.float32)
    assert h32.shape == (N, D)
    assert jnp.allclose(h32, ref32, atol=2e-3, rtol=2e-3), "f32 kernel mismatch"

    # (b) bf16 operands / f32 accumulation (full-rate MXU path) vs a reference
    #     applying the same rounding policy
    hbf = jax.block_until_ready(
        rgcn_forward(params, feat, node_idx, adj, compute_dtype=jnp.bfloat16))
    refbf = rgcn_forward_ref(params, feat, node_idx, src, dst, etype,
                             compute_dtype=jnp.bfloat16)
    assert hbf.shape == (N, D)
    assert jnp.allclose(hbf, refbf, atol=1e-2, rtol=1e-2), "bf16 kernel mismatch"

    print("KERNEL_OK")
</pallas_src>

<mosaic_0001>
module attributes {stable_mosaic.version = 11 : i64} {
  func.func @kernel(%arg0: i32, %arg1: memref<64x32xf32, #tpu.memory_space<vmem>>, %arg2: memref<5x32x32xf32, #tpu.memory_space<vmem>>, %arg3: memref<64x32xf32, #tpu.memory_space<vmem>>, %arg4: memref<4x64x32xf32, #tpu.memory_space<vmem>>) attributes {dimension_semantics = [#tpu.dimension_semantics<parallel>], iteration_bounds = array<i64: 1>, scalar_prefetch = 0 : i64, scratch_operands = 0 : i64, tpu.core_type = #tpu.core_type<tc>, window_params = [{transform_indices = @transform_0, window_bounds = array<i64: 64, 32>}, {pipeline_mode = #tpu.pipeline_mode<synchronous>, transform_indices = @transform_1, window_bounds = array<i64: 5, 32, 32>}, {transform_indices = @transform_2, window_bounds = array<i64: 64, 32>}, {transform_indices = @transform_3, window_bounds = array<i64: 4, 64, 32>}]} {
    %c0 = arith.constant 0 : index
    %c0_0 = arith.constant 0 : index
    %0 = vector.load %arg1[%c0, %c0_0] : memref<64x32xf32, #tpu.memory_space<vmem>>, vector<64x32xf32>
    %c0_1 = arith.constant 0 : index
    %c0_2 = arith.constant 0 : index
    %c0_3 = arith.constant 0 : index
    %1 = vector.load %arg2[%c0_1, %c0_2, %c0_3] : memref<5x32x32xf32, #tpu.memory_space<vmem>>, vector<1x32x32xf32>
    %2 = vector.shape_cast %1 : vector<1x32x32xf32> to vector<32x32xf32>
    %cst = arith.constant dense<0.000000e+00> : vector<64x32xf32>
    %3 = tpu.matmul %0, %2, %cst {dimension_numbers = #tpu.dot_dimension_numbers<[1], [0], [0], [1], [0, 0, 1, 1], [], []>} : vector<64x32xf32>, vector<32x32xf32>, vector<64x32xf32> -> vector<64x32xf32>
    %c0_4 = arith.constant 0 : index
    %c0_5 = arith.constant 0 : index
    %4 = vector.load %arg3[%c0_4, %c0_5] : memref<64x32xf32, #tpu.memory_space<vmem>>, vector<64x32xf32>
    tpu.vector_store %arg3[%c0_4, %c0_5], %3 {strides = array<i32>} : memref<64x32xf32, #tpu.memory_space<vmem>>, vector<64x32xf32>,
    %c1 = arith.constant 1 : index
    %c0_6 = arith.constant 0 : index
    %c0_7 = arith.constant 0 : index
    %5 = vector.load %arg2[%c1, %c0_6, %c0_7] : memref<5x32x32xf32, #tpu.memory_space<vmem>>, vector<1x32x32xf32>
    %6 = vector.shape_cast %5 : vector<1x32x32xf32> to vector<32x32xf32>
    %cst_8 = arith.constant dense<0.000000e+00> : vector<64x32xf32>
    %7 = tpu.matmul %0, %6, %cst_8 {dimension_numbers = #tpu.dot_dimension_numbers<[1], [0], [0], [1], [0, 0, 1, 1], [], []>} : vector<64x32xf32>, vector<32x32xf32>, vector<64x32xf32> -> vector<64x32xf32>
    %c0_9 = arith.constant 0 : index
    %c0_10 = arith.constant 0 : index
    %c0_11 = arith.constant 0 : index
    %8 = vector.load %arg4[%c0_9, %c0_10, %c0_11] : memref<4x64x32xf32, #tpu.memory_space<vmem>>, vector<1x64x32xf32>
    %9 = vector.shape_cast %8 : vector<1x64x32xf32> to vector<64x32xf32>
    %10 = vector.shape_cast %7 : vector<64x32xf32> to vector<1x64x32xf32>
    tpu.vector_store %arg4[%c0_9, %c0_10, %c0_11], %10 {strides = array<i32>} : memref<4x64x32xf32, #tpu.memory_space<vmem>>, vector<1x64x32xf32>,
    %c2 = arith.constant 2 : index
    %c0_12 = arith.constant 0 : index
    %c0_13 = arith.constant 0 : index
    %11 = vector.load %arg2[%c2, %c0_12, %c0_13] : memref<5x32x32xf32, #tpu.memory_space<vmem>>, vector<1x32x32xf32>
    %12 = vector.shape_cast %11 : vector<1x32x32xf32> to vector<32x32xf32>
    %cst_14 = arith.constant dense<0.000000e+00> : vector<64x32xf32>
    %13 = tpu.matmul %0, %12, %cst_14 {dimension_numbers = #tpu.dot_dimension_numbers<[1], [0], [0], [1], [0, 0, 1, 1], [], []>} : vector<64x32xf32>, vector<32x32xf32>, vector<64x32xf32> -> vector<64x32xf32>
    %c1_15 = arith.constant 1 : index
    %c0_16 = arith.constant 0 : index
    %c0_17 = arith.constant 0 : index
    %14 = vector.load %arg4[%c1_15, %c0_16, %c0_17] : memref<4x64x32xf32, #tpu.memory_space<vmem>>, vector<1x64x32xf32>
    %15 = vector.shape_cast %14 : vector<1x64x32xf32> to vector<64x32xf32>
    %16 = vector.shape_cast %13 : vector<64x32xf32> to vector<1x64x32xf32>
    tpu.vector_store %arg4[%c1_15, %c0_16, %c0_17], %16 {strides = array<i32>} : memref<4x64x32xf32, #tpu.memory_space<vmem>>, vector<1x64x32xf32>,
    %c3 = arith.constant 3 : index
    %c0_18 = arith.constant 0 : index
    %c0_19 = arith.constant 0 : index
    %17 = vector.load %arg2[%c3, %c0_18, %c0_19] : memref<5x32x32xf32, #tpu.memory_space<vmem>>, vector<1x32x32xf32>
    %18 = vector.shape_cast %17 : vector<1x32x32xf32> to vector<32x32xf32>
    %cst_20 = arith.constant dense<0.000000e+00> : vector<64x32xf32>
    %19 = tpu.matmul %0, %18, %cst_20 {dimension_numbers = #tpu.dot_dimension_numbers<[1], [0], [0], [1], [0, 0, 1, 1], [], []>} : vector<64x32xf32>, vector<32x32xf32>, vector<64x32xf32> -> vector<64x32xf32>
    %c2_21 = arith.constant 2 : index
    %c0_22 = arith.constant 0 : index
    %c0_23 = arith.constant 0 : index
    %20 = vector.load %arg4[%c2_21, %c0_22, %c0_23] : memref<4x64x32xf32, #tpu.memory_space<vmem>>, vector<1x64x32xf32>
    %21 = vector.shape_cast %20 : vector<1x64x32xf32> to vector<64x32xf32>
    %22 = vector.shape_cast %19 : vector<64x32xf32> to vector<1x64x32xf32>
    tpu.vector_store %arg4[%c2_21, %c0_22, %c0_23], %22 {strides = array<i32>} : memref<4x64x32xf32, #tpu.memory_space<vmem>>, vector<1x64x32xf32>,
    %c4 = arith.constant 4 : index
    %c0_24 = arith.constant 0 : index
    %c0_25 = arith.constant 0 : index
    %23 = vector.load %arg2[%c4, %c0_24, %c0_25] : memref<5x32x32xf32, #tpu.memory_space<vmem>>, vector<1x32x32xf32>
    %24 = vector.shape_cast %23 : vector<1x32x32xf32> to vector<32x32xf32>
    %cst_26 = arith.constant dense<0.000000e+00> : vector<64x32xf32>
    %25 = tpu.matmul %0, %24, %cst_26 {dimension_numbers = #tpu.dot_dimension_numbers<[1], [0], [0], [1], [0, 0, 1, 1], [], []>} : vector<64x32xf32>, vector<32x32xf32>, vector<64x32xf32> -> vector<64x32xf32>
    %c3_27 = arith.constant 3 : index
    %c0_28 = arith.constant 0 : index
    %c0_29 = arith.constant 0 : index
    %26 = vector.load %arg4[%c3_27, %c0_28, %c0_29] : memref<4x64x32xf32, #tpu.memory_space<vmem>>, vector<1x64x32xf32>
    %27 = vector.shape_cast %26 : vector<1x64x32xf32> to vector<64x32xf32>
    %28 = vector.shape_cast %25 : vector<64x32xf32> to vector<1x64x32xf32>
    tpu.vector_store %arg4[%c3_27, %c0_28, %c0_29], %28 {strides = array<i32>} : memref<4x64x32xf32, #tpu.memory_space<vmem>>, vector<1x64x32xf32>,
    return
  }
  func.func @transform_0(%arg0: i32) -> (i32, i32) {
    %c0_i32 = arith.constant 0 : i32
    %c0_i32_0 = arith.constant 0 : i32
    return %arg0, %c0_i32 : i32, i32
  }
  func.func @transform_1(%arg0: i32) -> (i32, i32, i32) {
    %c0_i32 = arith.constant 0 : i32
    %c0_i32_0 = arith.constant 0 : i32
    %c0_i32_1 = arith.constant 0 : i32
    %c0_i32_2 = arith.constant 0 : i32
    return %c0_i32, %c0_i32_0, %c0_i32_1 : i32, i32, i32
  }
  func.func @transform_2(%arg0: i32) -> (i32, i32) {
    %c0_i32 = arith.constant 0 : i32
    %c0_i32_0 = arith.constant 0 : i32
    return %arg0, %c0_i32 : i32, i32
  }
  func.func @transform_3(%arg0: i32) -> (i32, i32, i32) {
    %c0_i32 = arith.constant 0 : i32
    %c0_i32_0 = arith.constant 0 : i32
    %c0_i32_1 = arith.constant 0 : i32
    return %c0_i32, %arg0, %c0_i32_0 : i32, i32, i32
  }
}

module attributes {stable_mosaic.version = 11 : i64} {
  func.func @kernel(%arg0: i32, %arg1: i32, %arg2: memref<4x64x64xi8, #tpu.memory_space<vmem>>, %arg3: memref<4x64x32xf32, #tpu.memory_space<vmem>>, %arg4: memref<64x32xf32, #tpu.memory_space<vmem>>, %arg5: memref<64x32xf32, #tpu.memory_space<vmem>>, %arg6: memref<64x32xf32, #tpu.memory_space<vmem>>) attributes {dimension_semantics = [#tpu.dimension_semantics<parallel>, #tpu.dimension_semantics<arbitrary>], iteration_bounds = array<i64: 1, 1>, scalar_prefetch = 0 : i64, scratch_operands = 1 : i64, tpu.core_type = #tpu.core_type<tc>, window_params = [{transform_indices = @transform_0, window_bounds = array<i64: 4, 64, 64>}, {transform_indices = @transform_1, window_bounds = array<i64: 4, 64, 32>}, {transform_indices = @transform_2, window_bounds = array<i64: 64, 32>}, {transform_indices = @transform_3, window_bounds = array<i64: 64, 32>}]} {
    %c0_i32 = arith.constant 0 : i32
    %0 = arith.cmpi eq, %arg1, %c0_i32 : i32
    %1 = arith.extui %0 : i1 to i32
    %c0_i32_0 = arith.constant 0 : i32
    %2 = arith.cmpi ne, %1, %c0_i32_0 : i32
    scf.if %2 {
      %c0_42 = arith.constant 0 : index
      %c0_43 = arith.constant 0 : index
      %42 = vector.load %arg4[%c0_42, %c0_43] : memref<64x32xf32, #tpu.memory_space<vmem>>, vector<64x32xf32>
      %c0_44 = arith.constant 0 : index
      %c0_45 = arith.constant 0 : index
      %43 = vector.load %arg6[%c0_44, %c0_45] : memref<64x32xf32, #tpu.memory_space<vmem>>, vector<64x32xf32>
      tpu.vector_store %arg6[%c0_44, %c0_45], %42 {strides = array<i32>} : memref<64x32xf32, #tpu.memory_space<vmem>>, vector<64x32xf32>,
    } else {
    }
    %c0 = arith.constant 0 : index
    %c0_1 = arith.constant 0 : index
    %c0_2 = arith.constant 0 : index
    %3 = vector.load %arg2[%c0, %c0_1, %c0_2] : memref<4x64x64xi8, #tpu.memory_space<vmem>>, vector<1x64x64xi8>
    %4 = vector.shape_cast %3 : vector<1x64x64xi8> to vector<64x64xi8>
    %5 = arith.sitofp %4 : vector<64x64xi8> to vector<64x64xf32>
    %c0_3 = arith.constant 0 : index
    %c0_4 = arith.constant 0 : index
    %6 = vector.load %arg6[%c0_3, %c0_4] : memref<64x32xf32, #tpu.memory_space<vmem>>, vector<64x32xf32>
    %c0_5 = arith.constant 0 : index
    %c0_6 = arith.constant 0 : index
    %c0_7 = arith.constant 0 : index
    %7 = vector.load %arg3[%c0_5, %c0_6, %c0_7] : memref<4x64x32xf32, #tpu.memory_space<vmem>>, vector<1x64x32xf32>
    %8 = vector.shape_cast %7 : vector<1x64x32xf32> to vector<64x32xf32>
    %cst = arith.constant dense<0.000000e+00> : vector<64x32xf32>
    %9 = tpu.matmul %5, %8, %cst {dimension_numbers = #tpu.dot_dimension_numbers<[1], [0], [0], [1], [0, 0, 1, 1], [], []>} : vector<64x64xf32>, vector<64x32xf32>, vector<64x32xf32> -> vector<64x32xf32>
    %10 = arith.addf %6, %9 : vector<64x32xf32>
    %c0_8 = arith.constant 0 : index
    %c0_9 = arith.constant 0 : index
    %11 = vector.load %arg6[%c0_8, %c0_9] : memref<64x32xf32, #tpu.memory_space<vmem>>, vector<64x32xf32>
    tpu.vector_store %arg6[%c0_8, %c0_9], %10 {strides = array<i32>} : memref<64x32xf32, #tpu.memory_space<vmem>>, vector<64x32xf32>,
    %c1 = arith.constant 1 : index
    %c0_10 = arith.constant 0 : index
    %c0_11 = arith.constant 0 : index
    %12 = vector.load %arg2[%c1, %c0_10, %c0_11] : memref<4x64x64xi8, #tpu.memory_space<vmem>>, vector<1x64x64xi8>
    %13 = vector.shape_cast %12 : vector<1x64x64xi8> to vector<64x64xi8>
    %14 = arith.sitofp %13 : vector<64x64xi8> to vector<64x64xf32>
    %c0_12 = arith.constant 0 : index
    %c0_13 = arith.constant 0 : index
    %15 = vector.load %arg6[%c0_12, %c0_13] : memref<64x32xf32, #tpu.memory_space<vmem>>, vector<64x32xf32>
    %c1_14 = arith.constant 1 : index
    %c0_15 = arith.constant 0 : index
    %c0_16 = arith.constant 0 : index
    %16 = vector.load %arg3[%c1_14, %c0_15, %c0_16] : memref<4x64x32xf32, #tpu.memory_space<vmem>>, vector<1x64x32xf32>
    %17 = vector.shape_cast %16 : vector<1x64x32xf32> to vector<64x32xf32>
    %cst_17 = arith.constant dense<0.000000e+00> : vector<64x32xf32>
    %18 = tpu.matmul %14, %17, %cst_17 {dimension_numbers = #tpu.dot_dimension_numbers<[1], [0], [0], [1], [0, 0, 1, 1], [], []>} : vector<64x64xf32>, vector<64x32xf32>, vector<64x32xf32> -> vector<64x32xf32>
    %19 = arith.addf %15, %18 : vector<64x32xf32>
    %c0_18 = arith.constant 0 : index
    %c0_19 = arith.constant 0 : index
    %20 = vector.load %arg6[%c0_18, %c0_19] : memref<64x32xf32, #tpu.memory_space<vmem>>, vector<64x32xf32>
    tpu.vector_store %arg6[%c0_18, %c0_19], %19 {strides = array<i32>} : memref<64x32xf32, #tpu.memory_space<vmem>>, vector<64x32xf32>,
    %c2 = arith.constant 2 : index
    %c0_20 = arith.constant 0 : index
    %c0_21 = arith.constant 0 : index
    %21 = vector.load %arg2[%c2, %c0_20, %c0_21] : memref<4x64x64xi8, #tpu.memory_space<vmem>>, vector<1x64x64xi8>
    %22 = vector.shape_cast %21 : vector<1x64x64xi8> to vector<64x64xi8>
    %23 = arith.sitofp %22 : vector<64x64xi8> to vector<64x64xf32>
    %c0_22 = arith.constant 0 : index
    %c0_23 = arith.constant 0 : index
    %24 = vector.load %arg6[%c0_22, %c0_23] : memref<64x32xf32, #tpu.memory_space<vmem>>, vector<64x32xf32>
    %c2_24 = arith.constant 2 : index
    %c0_25 = arith.constant 0 : index
    %c0_26 = arith.constant 0 : index
    %25 = vector.load %arg3[%c2_24, %c0_25, %c0_26] : memref<4x64x32xf32, #tpu.memory_space<vmem>>, vector<1x64x32xf32>
    %26 = vector.shape_cast %25 : vector<1x64x32xf32> to vector<64x32xf32>
    %cst_27 = arith.constant dense<0.000000e+00> : vector<64x32xf32>
    %27 = tpu.matmul %23, %26, %cst_27 {dimension_numbers = #tpu.dot_dimension_numbers<[1], [0], [0], [1], [0, 0, 1, 1], [], []>} : vector<64x64xf32>, vector<64x32xf32>, vector<64x32xf32> -> vector<64x32xf32>
    %28 = arith.addf %24, %27 : vector<64x32xf32>
    %c0_28 = arith.constant 0 : index
    %c0_29 = arith.constant 0 : index
    %29 = vector.load %arg6[%c0_28, %c0_29] : memref<64x32xf32, #tpu.memory_space<vmem>>, vector<64x32xf32>
    tpu.vector_store %arg6[%c0_28, %c0_29], %28 {strides = array<i32>} : memref<64x32xf32, #tpu.memory_space<vmem>>, vector<64x32xf32>,
    %c3 = arith.constant 3 : index
    %c0_30 = arith.constant 0 : index
    %c0_31 = arith.constant 0 : index
    %30 = vector.load %arg2[%c3, %c0_30, %c0_31] : memref<4x64x64xi8, #tpu.memory_space<vmem>>, vector<1x64x64xi8>
    %31 = vector.shape_cast %30 : vector<1x64x64xi8> to vector<64x64xi8>
    %32 = arith.sitofp %31 : vector<64x64xi8> to vector<64x64xf32>
    %c0_32 = arith.constant 0 : index
    %c0_33 = arith.constant 0 : index
    %33 = vector.load %arg6[%c0_32, %c0_33] : memref<64x32xf32, #tpu.memory_space<vmem>>, vector<64x32xf32>
    %c3_34 = arith.constant 3 : index
    %c0_35 = arith.constant 0 : index
    %c0_36 = arith.constant 0 : index
    %34 = vector.load %arg3[%c3_34, %c0_35, %c0_36] : memref<4x64x32xf32, #tpu.memory_space<vmem>>, vector<1x64x32xf32>
    %35 = vector.shape_cast %34 : vector<1x64x32xf32> to vector<64x32xf32>
    %cst_37 = arith.constant dense<0.000000e+00> : vector<64x32xf32>
    %36 = tpu.matmul %32, %35, %cst_37 {dimension_numbers = #tpu.dot_dimension_numbers<[1], [0], [0], [1], [0, 0, 1, 1], [], []>} : vector<64x64xf32>, vector<64x32xf32>, vector<64x32xf32> -> vector<64x32xf32>
    %37 = arith.addf %33, %36 : vector<64x32xf32>
    %c0_38 = arith.constant 0 : index
    %c0_39 = arith.constant 0 : index
    %38 = vector.load %arg6[%c0_38, %c0_39] : memref<64x32xf32, #tpu.memory_space<vmem>>, vector<64x32xf32>
    tpu.vector_store %arg6[%c0_38, %c0_39], %37 {strides = array<i32>} : memref<64x32xf32, #tpu.memory_space<vmem>>, vector<64x32xf32>,
    %c0_i32_40 = arith.constant 0 : i32
    %39 = arith.cmpi eq, %arg1, %c0_i32_40 : i32
    %40 = arith.extui %39 : i1 to i32
    %c0_i32_41 = arith.constant 0 : i32
    %41 = arith.cmpi ne, %40, %c0_i32_41 : i32
    scf.if %41 {
      %c0_42 = arith.constant 0 : index
      %c0_43 = arith.constant 0 : index
      %42 = vector.load %arg6[%c0_42, %c0_43] : memref<64x32xf32, #tpu.memory_space<vmem>>, vector<64x32xf32>
      %cst_44 = arith.constant 0.000000e+00 : f32
      %43 = vector.broadcast %cst_44 : f32 to vector<64x32xf32>
      %44 = arith.maximumf %42, %43 : vector<64x32xf32>
      %c0_45 = arith.constant 0 : index
      %c0_46 = arith.constant 0 : index
      %45 = vector.load %arg5[%c0_45, %c0_46] : memref<64x32xf32, #tpu.memory_space<vmem>>, vector<64x32xf32>
      tpu.vector_store %arg5[%c0_45, %c0_46], %44 {strides = array<i32>} : memref<64x32xf32, #tpu.memory_space<vmem>>, vector<64x32xf32>,
    } else {
    }
    return
  }
  func.func @transform_0(%arg0: i32, %arg1: i32) -> (i32, i32, i32) {
    %c0_i32 = arith.constant 0 : i32
    %c0_i32_0 = arith.constant 0 : i32
    return %c0_i32, %arg0, %arg1 : i32, i32, i32
  }
  func.func @transform_1(%arg0: i32, %arg1: i32) -> (i32, i32, i32) {
    %c0_i32 = arith.constant 0 : i32
    %c0_i32_0 = arith.constant 0 : i32
    %c0_i32_1 = arith.constant 0 : i32
    return %c0_i32, %arg1, %c0_i32_0 : i32, i32, i32
  }
  func.func @transform_2(%arg0: i32, %arg1: i32) -> (i32, i32) {
    %c0_i32 = arith.constant 0 : i32
    %c0_i32_0 = arith.constant 0 : i32
    return %arg0, %c0_i32 : i32, i32
  }
  func.func @transform_3(%arg0: i32, %arg1: i32) -> (i32, i32) {
    %c0_i32 = arith.constant 0 : i32
    %c0_i32_0 = arith.constant 0 : i32
    return %arg0, %c0_i32 : i32, i32
  }
}

</mosaic_0001>

<bundles_post_ra>
// kernel: rgcn_forward.4
= control target key start
LH: loop header
LB: loop body
LE: loop exit
PB: predicated region body
PF: predicated region fallthrough
CT: control target
= control target key end

     0   :  { %vm25_vm0 = vcmask 261120   ;;  %s1254_s1 = inlined_call_operand.vmem [shape: f32[5,32,32], index: 1, kind: input, shape index: {}]   ;;  %s1255_s0 = inlined_call_operand.vmem [shape: f32[64,32], index: 0, kind: input, shape index: {}]   ;;  %s1256_s2 = inlined_call_operand.vmem [shape: f32[64,32], index: 2, kind: output, shape index: {0}]   ;;  %s1257_s3 = inlined_call_operand.vmem [shape: f32[4,64,32], index: 3, kind: output, shape index: {1}]  }
   0x1   :  { %v24_v0 = vld [vmem:[%s1254_s1 + $0x18] sm:$0xff]  ;;  %v23_v1 = vld [vmem:[%s1254_s1 + $0x10] sm:$0xff]  ;;  %v22_v2 = vld [vmem:[%s1254_s1 + $0x8] sm:$0xff] }
   0x2   :  { %786 = vmatprep.subr.mxu0 %v24_v0  ;;  %886 = vmatprep.subr.mxu1 %v24_v0  ;;  %v21_v3 = vld [vmem:[%s1254_s1] sm:$0xff]  ;;  %v939_v6 = vld [vmem:[%s1255_s0 + $0x8] sm:$0xff]  ;;  %v657_v8 = vld [vmem:[%s1254_s1 + $0x38] sm:$0xff] }
   0x3   :  { %787 = vmatpush3.msra.mxu0 %v24_v0  ;;  %890 = vmatpush3.msra.mxu1 %v24_v0  ;;  %v929_v4 = vld [vmem:[%s1255_s0] sm:$0xff]  ;;  %v944_v7 = vld [vmem:[%s1255_s0 + $0x28] sm:$0xff]  ;;  %v669_v9 = vld [vmem:[%s1254_s1 + $0x58] sm:$0xff] }
   0x4   :  { %788 = vmatprep.subr.mxu0 %v23_v1  ;;  %887 = vmatprep.subr.mxu1 %v23_v1  ;;  %v934_v5 = vld [vmem:[%s1255_s0 + $0x20] sm:$0xff]  ;;  %v656_v10 = vld [vmem:[%s1254_s1 + $0x30] sm:$0xff]  ;;  %v979_v14 = vld [vmem:[%s1255_s0 + $0x18] sm:$0xff] }
   0x5   :  { %789 = vmatpush3.msra.mxu0 %v23_v1  ;;  %891 = vmatpush3.msra.mxu1 %v23_v1  ;;  %v668_v11 = vld [vmem:[%s1254_s1 + $0x50] sm:$0xff]  ;;  %v984_v15 = vld [vmem:[%s1255_s0 + $0x38] sm:$0xff]  ;;  %v655_v16 = vld [vmem:[%s1254_s1 + $0x28] sm:$0xff] }
   0x6   :  { %790 = vmatprep.subr.mxu0 %v22_v2  ;;  %888 = vmatprep.subr.mxu1 %v22_v2  ;;  %v969_v12 = vld [vmem:[%s1255_s0 + $0x10] sm:$0xff]  ;;  %v667_v17 = vld [vmem:[%s1254_s1 + $0x48] sm:$0xff]  ;;  %v654_v18 = vld [vmem:[%s1254_s1 + $0x20] sm:$0xff] }
   0x7   :  { %791 = vmatpush3.msra.mxu0 %v22_v2  ;;  %892 = vmatpush3.msra.mxu1 %v22_v2  ;;  %v974_v13 = vld [vmem:[%s1255_s0 + $0x30] sm:$0xff]  ;;  %v666_v19 = vld [vmem:[%s1254_s1 + $0x40] sm:$0xff]  ;;  %v689_v20 = vld [vmem:[%s1254_s1 + $0x78] sm:$0xff] }
   0x8   :  { %792 = vmatprep.subr.mxu0 %v21_v3  ;;  %889 = vmatprep.subr.mxu1 %v21_v3  ;;  %v709_v21 = vld [vmem:[%s1254_s1 + $0x98] sm:$0xff]  ;;  %v688_v22 = vld [vmem:[%s1254_s1 + $0x70] sm:$0xff]  ;;  %v687_v24 = vld [vmem:[%s1254_s1 + $0x68] sm:$0xff] }
   0x9   :  { %793 = vmatpush3.msra.mxu0 %v21_v3  ;;  %893 = vmatpush3.msra.mxu1 %v21_v3  ;;  %v708_v23 = vld [vmem:[%s1254_s1 + $0x90] sm:$0xff]  ;;  %v707_v25 = vld [vmem:[%s1254_s1 + $0x88] sm:$0xff]  ;;  %v686_v26 = vld [vmem:[%s1254_s1 + $0x60] sm:$0xff] }
   0xa   :  { %794 = vmatprep.mubr.msk.f32.mxu0 %vm25_vm0, %v929_v4  ;;  %800 = vmatprep.mubr.msk.f32.mxu1 %vm25_vm0, %v934_v5  ;;  %v706_v27 = vld [vmem:[%s1254_s1 + $0x80] sm:$0xff] }
   0xb   :  { %795 = vmatmul.mubr.msk.f32.vlgmr.msra.gmra.mxu0 %vm25_vm0, %v939_v6  ;;  %801 = vmatmul.mubr.msk.f32.vlgmr.msra.gmra.mxu1 %vm25_vm0, %v944_v7 }
   0xc   :  { %806 = vmatprep.subr.mxu1 %v657_v8  ;;  %826 = vmatprep.subr.mxu0 %v669_v9 }
   0xd   :  { %807 = vmatpush3.msra.mxu1 %v657_v8  ;;  %827 = vmatpush3.msra.mxu0 %v669_v9 }
   0xe   :  { %808 = vmatprep.subr.mxu1 %v656_v10  ;;  %828 = vmatprep.subr.mxu0 %v668_v11 }
   0xf   :  { %797 = vmatprep.mubr.msk.f32.mxu0 %vm25_vm0, %v969_v12  ;;  %803 = vmatprep.mubr.msk.f32.mxu1 %vm25_vm0, %v974_v13 }
  0x10   :  { %809 = vmatpush3.msra.mxu1 %v656_v10  ;;  %829 = vmatpush3.msra.mxu0 %v668_v11 }
  0x11   :  { %798 = vmatmul.mubr.msk.f32.gmra.mxu0 %vm25_vm0, %v979_v14  ;;  %804 = vmatmul.mubr.msk.f32.gmra.mxu1 %vm25_vm0, %v984_v15 }
  0x12   :  { %810 = vmatprep.subr.mxu1 %v655_v16  ;;  %830 = vmatprep.subr.mxu0 %v667_v17 }
  0x13   :  { %811 = vmatpush3.msra.mxu1 %v655_v16  ;;  %831 = vmatpush3.msra.mxu0 %v667_v17 }
  0x14   :  { %812 = vmatprep.subr.mxu1 %v654_v18  ;;  %832 = vmatprep.subr.mxu0 %v666_v19 }
  0x15   :  { %813 = vmatpush3.msra.mxu1 %v654_v18  ;;  %814 = vmatprep.mubr.msk.f32.mxu1 %vm25_vm0, %v929_v4 }
  0x16   :  { %833 = vmatpush3.msra.mxu0 %v666_v19  ;;  %834 = vmatprep.mubr.msk.f32.mxu0 %vm25_vm0, %v929_v4 }
  0x17   :  { %815 = vmatmul.mubr.msk.f32.vlgmr.msra.gmra.mxu1 %vm25_vm0, %v939_v6  ;;  %835 = vmatmul.mubr.msk.f32.vlgmr.msra.gmra.mxu0 %vm25_vm0, %v939_v6 }
  0x18   :  { %846 = vmatprep.subr.mxu1 %v689_v20  ;;  %866 = vmatprep.subr.mxu0 %v709_v21 }
  0x19   :  { %847 = vmatpush3.msra.mxu1 %v689_v20  ;;  %867 = vmatpush3.msra.mxu0 %v709_v21 }
  0x1a   :  { %817 = vmatprep.mubr.msk.f32.mxu1 %vm25_vm0, %v969_v12  ;;  %837 = vmatprep.mubr.msk.f32.mxu0 %vm25_vm0, %v969_v12 }
  0x1b   :  { %818 = vmatmul.mubr.msk.f32.gmra.mxu1 %vm25_vm0, %v979_v14  ;;  %838 = vmatmul.mubr.msk.f32.gmra.mxu0 %vm25_vm0, %v979_v14 }
  0x1c   :  { %848 = vmatprep.subr.mxu1 %v688_v22  ;;  %868 = vmatprep.subr.mxu0 %v708_v23 }
  0x1d   :  { %849 = vmatpush3.msra.mxu1 %v688_v22  ;;  %869 = vmatpush3.msra.mxu0 %v708_v23 }
  0x1e   :  { %820 = vmatprep.mubr.msk.f32.mxu1 %vm25_vm0, %v934_v5  ;;  %840 = vmatprep.mubr.msk.f32.mxu0 %vm25_vm0, %v934_v5 }
  0x1f   :  { %821 = vmatmul.mubr.msk.f32.gmra.mxu1 %vm25_vm0, %v944_v7  ;;  %841 = vmatmul.mubr.msk.f32.gmra.mxu0 %vm25_vm0, %v944_v7 }
  0x20   :  { %850 = vmatprep.subr.mxu1 %v687_v24  ;;  %870 = vmatprep.subr.mxu0 %v707_v25 }
  0x21   :  { %851 = vmatpush3.msra.mxu1 %v687_v24  ;;  %871 = vmatpush3.msra.mxu0 %v707_v25 }
  0x22   :  { %823 = vmatprep.mubr.msk.f32.mxu1 %vm25_vm0, %v974_v13  ;;  %843 = vmatprep.mubr.msk.f32.mxu0 %vm25_vm0, %v974_v13 }
  0x23   :  { %824 = vmatmul.mubr.msk.f32.gmra.mxu1 %vm25_vm0, %v984_v15  ;;  %844 = vmatmul.mubr.msk.f32.gmra.mxu0 %vm25_vm0, %v984_v15 }
  0x24   :  { %852 = vmatprep.subr.mxu1 %v686_v26  ;;  %872 = vmatprep.subr.mxu0 %v706_v27 }
  0x25   :  { %853 = vmatpush3.msra.mxu1 %v686_v26  ;;  %873 = vmatpush3.msra.mxu0 %v706_v27 }
  0x26   :  { %854 = vmatprep.mubr.msk.f32.mxu1 %vm25_vm0, %v929_v4  ;;  %874 = vmatprep.mubr.msk.f32.mxu0 %vm25_vm0, %v929_v4 }
  0x27   :  { %855 = vmatmul.mubr.msk.f32.vlgmr.msra.gmra.mxu1 %vm25_vm0, %v939_v6  ;;  %875 = vmatmul.mubr.msk.f32.vlgmr.msra.gmra.mxu0 %vm25_vm0, %v939_v6 }
  0x28   :  { %857 = vmatprep.mubr.msk.f32.mxu1 %vm25_vm0, %v969_v12  ;;  %877 = vmatprep.mubr.msk.f32.mxu0 %vm25_vm0, %v969_v12 }
  0x2b   :  { %858 = vmatmul.mubr.msk.f32.gmra.mxu1 %vm25_vm0, %v979_v14  ;;  %878 = vmatmul.mubr.msk.f32.gmra.mxu0 %vm25_vm0, %v979_v14 }
  0x2c   :  { %860 = vmatprep.mubr.msk.f32.mxu1 %vm25_vm0, %v934_v5  ;;  %880 = vmatprep.mubr.msk.f32.mxu0 %vm25_vm0, %v934_v5 }
  0x2f   :  { %861 = vmatmul.mubr.msk.f32.gmra.mxu1 %vm25_vm0, %v944_v7  ;;  %881 = vmatmul.mubr.msk.f32.gmra.mxu0 %vm25_vm0, %v944_v7 }
  0x30   :  { %863 = vmatprep.mubr.msk.f32.mxu1 %vm25_vm0, %v974_v13  ;;  %883 = vmatprep.mubr.msk.f32.mxu0 %vm25_vm0, %v974_v13 }
  0x33   :  { %864 = vmatmul.mubr.msk.f32.gmra.mxu1 %vm25_vm0, %v984_v15  ;;  %884 = vmatmul.mubr.msk.f32.gmra.mxu0 %vm25_vm0, %v984_v15 }
  0xcb   :  { %v796_v28 = vpop.f32.mrf.mxu0  ;;  %v802_v29 = vpop.f32.mrf.mxu1 }
  0xcc   :  { %156 = vst.msk [vmem:[%s1256_s2 + $0x8] sm:$0xff] %vm25_vm0, %v796_v28  ;;  %160 = vst.msk [vmem:[%s1256_s2 + $0x28] sm:$0xff] %vm25_vm0, %v802_v29 }
  0xcd   :  { %v116_v30 = vpop.f32.mrf.mxu0  ;;  %v136_v31 = vpop.f32.mrf.mxu1 }
  0xce   :  { %155 = vst.msk [vmem:[%s1256_s2] sm:$0xff] %vm25_vm0, %v116_v30  ;;  %159 = vst.msk [vmem:[%s1256_s2 + $0x20] sm:$0xff] %vm25_vm0, %v136_v31 }
  0xd1   :  { %v799_v32 = vpop.f32.mrf.mxu0  ;;  %v805_v33 = vpop.f32.mrf.mxu1 }
  0xd2   :  { %158 = vst.msk [vmem:[%s1256_s2 + $0x18] sm:$0xff] %vm25_vm0, %v799_v32  ;;  %162 = vst.msk [vmem:[%s1256_s2 + $0x38] sm:$0xff] %vm25_vm0, %v805_v33 }
  0xd3   :  { %v126_v34 = vpop.f32.mrf.mxu0  ;;  %v146_v35 = vpop.f32.mrf.mxu1 }
  0xd4   :  { %157 = vst.msk [vmem:[%s1256_s2 + $0x10] sm:$0xff] %vm25_vm0, %v126_v34  ;;  %161 = vst.msk [vmem:[%s1256_s2 + $0x30] sm:$0xff] %vm25_vm0, %v146_v35 }
  0xd7   :  { %v816_v36 = vpop.f32.mrf.mxu1  ;;  %v836_v37 = vpop.f32.mrf.mxu0 }
  0xd8   :  { %274 = vst.msk [vmem:[%s1257_s3 + $0x8] sm:$0xff] %vm25_vm0, %v816_v36  ;;  %679 = vst.msk [vmem:[%s1257_s3 + $0x48] sm:$0xff] %vm25_vm0, %v836_v37 }
  0xd9   :  { %v234_v38 = vpop.f32.mrf.mxu1  ;;  %v352_v39 = vpop.f32.mrf.mxu0 }
  0xda   :  { %273 = vst.msk [vmem:[%s1257_s3] sm:$0xff] %vm25_vm0, %v234_v38  ;;  %678 = vst.msk [vmem:[%s1257_s3 + $0x40] sm:$0xff] %vm25_vm0, %v352_v39 }
  0xdb   :  { %v819_v40 = vpop.f32.mrf.mxu1  ;;  %v839_v41 = vpop.f32.mrf.mxu0 }
  0xdc   :  { %276 = vst.msk [vmem:[%s1257_s3 + $0x18] sm:$0xff] %vm25_vm0, %v819_v40  ;;  %681 = vst.msk [vmem:[%s1257_s3 + $0x58] sm:$0xff] %vm25_vm0, %v839_v41 }
  0xdd   :  { %v244_v42 = vpop.f32.mrf.mxu1  ;;  %v362_v43 = vpop.f32.mrf.mxu0 }
  0xde   :  { %275 = vst.msk [vmem:[%s1257_s3 + $0x10] sm:$0xff] %vm25_vm0, %v244_v42  ;;  %680 = vst.msk [vmem:[%s1257_s3 + $0x50] sm:$0xff] %vm25_vm0, %v362_v43 }
  0xdf   :  { %v822_v44 = vpop.f32.mrf.mxu1  ;;  %v842_v45 = vpop.f32.mrf.mxu0 }
  0xe0   :  { %278 = vst.msk [vmem:[%s1257_s3 + $0x28] sm:$0xff] %vm25_vm0, %v822_v44  ;;  %683 = vst.msk [vmem:[%s1257_s3 + $0x68] sm:$0xff] %vm25_vm0, %v842_v45 }
  0xe1   :  { %v254_v46 = vpop.f32.mrf.mxu1  ;;  %v372_v47 = vpop.f32.mrf.mxu0 }
  0xe2   :  { %277 = vst.msk [vmem:[%s1257_s3 + $0x20] sm:$0xff] %vm25_vm0, %v254_v46  ;;  %682 = vst.msk [vmem:[%s1257_s3 + $0x60] sm:$0xff] %vm25_vm0, %v372_v47 }
  0xe3   :  { %v825_v48 = vpop.f32.mrf.mxu1  ;;  %v845_v49 = vpop.f32.mrf.mxu0 }
  0xe4   :  { %280 = vst.msk [vmem:[%s1257_s3 + $0x38] sm:$0xff] %vm25_vm0, %v825_v48  ;;  %685 = vst.msk [vmem:[%s1257_s3 + $0x78] sm:$0xff] %vm25_vm0, %v845_v49 }
  0xe5   :  { %v264_v50 = vpop.f32.mrf.mxu1  ;;  %v382_v51 = vpop.f32.mrf.mxu0 }
  0xe6   :  { %279 = vst.msk [vmem:[%s1257_s3 + $0x30] sm:$0xff] %vm25_vm0, %v264_v50  ;;  %684 = vst.msk [vmem:[%s1257_s3 + $0x70] sm:$0xff] %vm25_vm0, %v382_v51 }
  0xe7   :  { %v856_v52 = vpop.f32.mrf.mxu1  ;;  %v876_v53 = vpop.f32.mrf.mxu0 }
  0xe8   :  { %699 = vst.msk [vmem:[%s1257_s3 + $0x88] sm:$0xff] %vm25_vm0, %v856_v52  ;;  %719 = vst.msk [vmem:[%s1257_s3 + $0xc8] sm:$0xff] %vm25_vm0, %v876_v53 }
  0xe9   :  { %v471_v54 = vpop.f32.mrf.mxu1  ;;  %v590_v55 = vpop.f32.mrf.mxu0 }
  0xea   :  { %698 = vst.msk [vmem:[%s1257_s3 + $0x80] sm:$0xff] %vm25_vm0, %v471_v54  ;;  %718 = vst.msk [vmem:[%s1257_s3 + $0xc0] sm:$0xff] %vm25_vm0, %v590_v55 }
  0xeb   :  { %v859_v56 = vpop.f32.mrf.mxu1  ;;  %v879_v57 = vpop.f32.mrf.mxu0 }
  0xec   :  { %701 = vst.msk [vmem:[%s1257_s3 + $0x98] sm:$0xff] %vm25_vm0, %v859_v56  ;;  %721 = vst.msk [vmem:[%s1257_s3 + $0xd8] sm:$0xff] %vm25_vm0, %v879_v57 }
  0xed   :  { %v481_v58 = vpop.f32.mrf.mxu1  ;;  %v600_v59 = vpop.f32.mrf.mxu0 }
  0xee   :  { %700 = vst.msk [vmem:[%s1257_s3 + $0x90] sm:$0xff] %vm25_vm0, %v481_v58  ;;  %720 = vst.msk [vmem:[%s1257_s3 + $0xd0] sm:$0xff] %vm25_vm0, %v600_v59 }
  0xef   :  { %v862_v60 = vpop.f32.mrf.mxu1  ;;  %v882_v61 = vpop.f32.mrf.mxu0 }
  0xf0   :  { %703 = vst.msk [vmem:[%s1257_s3 + $0xa8] sm:$0xff] %vm25_vm0, %v862_v60  ;;  %723 = vst.msk [vmem:[%s1257_s3 + $0xe8] sm:$0xff] %vm25_vm0, %v882_v61 }
  0xf1   :  { %v491_v62 = vpop.f32.mrf.mxu1  ;;  %v610_v63 = vpop.f32.mrf.mxu0 }
  0xf2   :  { %702 = vst.msk [vmem:[%s1257_s3 + $0xa0] sm:$0xff] %vm25_vm0, %v491_v62  ;;  %722 = vst.msk [vmem:[%s1257_s3 + $0xe0] sm:$0xff] %vm25_vm0, %v610_v63 }
  0xf3   :  { %v865_v0 = vpop.f32.mrf.mxu1  ;;  %v885_v1 = vpop.f32.mrf.mxu0 }
  0xf4   :  { %705 = vst.msk [vmem:[%s1257_s3 + $0xb8] sm:$0xff] %vm25_vm0, %v865_v0  ;;  %725 = vst.msk [vmem:[%s1257_s3 + $0xf8] sm:$0xff] %vm25_vm0, %v885_v1 }
  0xf5   :  { %v501_v2 = vpop.f32.mrf.mxu1  ;;  %v620_v3 = vpop.f32.mrf.mxu0 }
  0xf6   :  { %704 = vst.msk [vmem:[%s1257_s3 + $0xb0] sm:$0xff] %vm25_vm0, %v501_v2  ;;  %724 = vst.msk [vmem:[%s1257_s3 + $0xf0] sm:$0xff] %vm25_vm0, %v620_v3 }

// kernel: rgcn_forward.5
= control target key start
LH: loop header
LB: loop body
LE: loop exit
PB: predicated region body
PF: predicated region fallthrough
CT: control target
= control target key end

     0   :  { %vm69_vm0 = vcmask 523264   ;;  %vm26_vm1 = vcmask 261120   ;;  %s1302_s1 = inlined_call_operand.vmem [shape: f32[4,64,32], index: 1, kind: input, shape index: {}]   ;;  %s1303_s0 = inlined_call_operand.vmem [shape: s8[4,64,64], index: 0, kind: input, shape index: {}]   ;;  %s1304_s2 = inlined_call_operand.vmem [shape: f32[64,32], index: 2, kind: input, shape index: {}]   ;;  %s1305_s3 = inlined_call_operand.vmem [shape: f32[64,32], index: 3, kind: output, shape index: {}]  }
   0x1   :  { %v68_v0 = vld [vmem:[%s1302_s1 + $0x38] sm:$0xff]  ;;  %v67_v1 = vld [vmem:[%s1302_s1 + $0x30] sm:$0xff]  ;;  %v66_v3 = vld [vmem:[%s1302_s1 + $0x28] sm:$0xff] }
   0x2   :  { %916 = vmatprep.subr.mxu0 %v68_v0  ;;  %v807_v2 = vld [vmem:[%s1302_s1 + $0x78] sm:$0xff]  ;;  %v806_v4 = vld [vmem:[%s1302_s1 + $0x70] sm:$0xff]  ;;  %v805_v5 = vld [vmem:[%s1302_s1 + $0x68] sm:$0xff] }
   0x3   :  { %917 = vmatpush3.msra.mxu0 %v68_v0  ;;  %944 = vmatprep.subr.mxu1 %v807_v2  ;;  %v65_v6 = vld [vmem:[%s1302_s1 + $0x20] sm:$0xff]  ;;  %v64_v10 = vld [vmem:[%s1302_s1 + $0x18] sm:$0xff]  ;;  %v63_v12 = vld [vmem:[%s1302_s1 + $0x10] sm:$0xff] }
   0x4   :  { %918 = vmatprep.subr.mxu0 %v67_v1  ;;  %945 = vmatpush3.msra.mxu1 %v807_v2  ;;  %v35_v7 = vld [vmem:[%s1303_s0] sm:$0xff]  ;;  %v803_v13 = vld [vmem:[%s1302_s1 + $0x58] sm:$0xff]  ;;  %v62_v15 = vld [vmem:[%s1302_s1 + $0x8] sm:$0xff] }
   0x5   :  { %919 = vmatpush3.msra.mxu0 %v67_v1  ;;  %946 = vmatprep.subr.mxu1 %v806_v4  ;;  %v804_v8 = vld [vmem:[%s1302_s1 + $0x60] sm:$0xff]  ;;  %v37_v9 = vunpack.c.0.s8 %v35_v7  ;;  %v38_v14 = vunpack.c.1.s8 %v35_v7  ;;  %v802_v16 = vld [vmem:[%s1302_s1 + $0x50] sm:$0xff]  ;;  %v39_v17 = vunpack.c.2.s8 %v35_v7  ;;  %v1094_v18 = vld [vmem:[%s1303_s0 + $0x8] sm:$0xff]  ;;  %v40_v23 = vunpack.c.3.s8 %v35_v7 }
   0x6   :  { %920 = vmatprep.subr.mxu0 %v66_v3  ;;  %947 = vmatpush3.msra.mxu1 %v806_v4  ;;  %v798_v19 = vld [vmem:[%s1303_s0 + $0x10] sm:$0xff]  ;;  %v61_v20 = vld [vmem:[%s1302_s1] sm:$0xff]  ;;  %v801_v21 = vld [vmem:[%s1302_s1 + $0x48] sm:$0xff]  ;;  %v41_v27 = vunpack.c.0.s8 %v1094_v18  ;;  %v42_v34 = vunpack.c.1.s8 %v1094_v18  ;;  %v43_v38 = vunpack.c.2.s8 %v1094_v18  ;;  %v44_v45 = vunpack.c.3.s8 %v1094_v18 }
   0x7   :  { %921 = vmatpush3.msra.mxu0 %v66_v3  ;;  %948 = vmatprep.subr.mxu1 %v805_v5  ;;  %v45_v11 = vcvt.s32.f32 %v37_v9  ;;  %v46_v22 = vcvt.s32.f32 %v38_v14  ;;  %v19_v24 = vld [vmem:[%s1304_s2 + $0x8] sm:$0xff]  ;;  %v825_v25 = vld [vmem:[%s1302_s1 + $0xb8] sm:$0xff]  ;;  %v47_v26 = vcvt.s32.f32 %v39_v17  ;;  %v219_v28 = vunpack.c.0.s8 %v798_v19  ;;  %v824_v30 = vld [vmem:[%s1302_s1 + $0xb0] sm:$0xff] }
   0x8   :  { %922 = vmatprep.subr.mxu0 %v65_v6  ;;  %949 = vmatpush3.msra.mxu1 %v805_v5  ;;  %28 = vst.msk [vmem:[#allocation2 + $0x8] sm:$0xff] %vm26_vm1, %v19_v24  ;;  %v220_v29 = vunpack.c.1.s8 %v798_v19  ;;  %v800_v31 = vld [vmem:[%s1302_s1 + $0x40] sm:$0xff]  ;;  %v221_v32 = vunpack.c.2.s8 %v798_v19  ;;  %v48_v33 = vcvt.s32.f32 %v40_v23  ;;  %v823_v35 = vld [vmem:[%s1302_s1 + $0xa8] sm:$0xff]  ;;  %v49_v36 = vcvt.s32.f32 %v41_v27  ;;  %v799_v42 = vld [vmem:[%s1303_s0 + $0x18] sm:$0xff] }
   0x9   :  { %923 = vmatpush3.msra.mxu0 %v65_v6  ;;  %950 = vmatprep.subr.mxu1 %v804_v8  ;;  %v227_v37 = vcvt.s32.f32 %v219_v28  ;;  %v222_v40 = vunpack.c.3.s8 %v798_v19  ;;  %v50_v43 = vcvt.s32.f32 %v42_v34  ;;  %v822_v44 = vld [vmem:[%s1302_s1 + $0xa0] sm:$0xff]  ;;  %v51_v46 = vcvt.s32.f32 %v43_v38  ;;  %v843_v47 = vld [vmem:[%s1302_s1 + $0xf8] sm:$0xff]  ;;  %v820_v54 = vld [vmem:[%s1302_s1 + $0x90] sm:$0xff] }
   0xa   :  { %924 = vmatprep.subr.mxu0 %v64_v10  ;;  %932 = vmatprep.mubr.msk.f32.mxu0 %vm69_vm0, %v45_v11  ;;  %v228_v39 = vcvt.s32.f32 %v220_v29  ;;  %v229_v41 = vcvt.s32.f32 %v221_v32  ;;  %v223_v49 = vunpack.c.0.s8 %v799_v42  ;;  %v821_v50 = vld [vmem:[%s1302_s1 + $0x98] sm:$0xff]  ;;  %v816_v51 = vld [vmem:[%s1303_s0 + $0x20] sm:$0xff]  ;;  %v52_v52 = vcvt.s32.f32 %v44_v45  ;;  %v842_v55 = vld [vmem:[%s1302_s1 + $0xf0] sm:$0xff] }
   0xb   :  { %925 = vmatpush3.msra.mxu0 %v64_v10  ;;  %951 = vmatpush3.msra.mxu1 %v804_v8  ;;  %v230_v48 = vcvt.s32.f32 %v222_v40  ;;  %v224_v53 = vunpack.c.1.s8 %v799_v42  ;;  %v400_v57 = vunpack.c.0.s8 %v816_v51  ;;  %v819_v58 = vld [vmem:[%s1302_s1 + $0x88] sm:$0xff]  ;;  %v401_v59 = vunpack.c.1.s8 %v816_v51  ;;  %v818_v62 = vld [vmem:[%s1302_s1 + $0x80] sm:$0xff]  ;;  %v834_v4 = vld [vmem:[%s1303_s0 + $0x30] sm:$0xff] }
   0xc   :  { %926 = vmatprep.subr.mxu0 %v63_v12  ;;  %952 = vmatprep.subr.mxu1 %v803_v13  ;;  %v231_v56 = vcvt.s32.f32 %v223_v49  ;;  %v225_v61 = vunpack.c.2.s8 %v799_v42  ;;  %v226_v63 = vunpack.c.3.s8 %v799_v42  ;;  %v817_v0 = vld [vmem:[%s1303_s0 + $0x28] sm:$0xff]  ;;  %v402_v3 = vunpack.c.2.s8 %v816_v51  ;;  %v840_v7 = vld [vmem:[%s1302_s1 + $0xe0] sm:$0xff]  ;;  %v21_v42 = vld [vmem:[%s1304_s2 + $0x18] sm:$0xff] }
   0xd   :  { %927 = vmatpush3.msra.mxu0 %v63_v12  ;;  %953 = vmatpush3.msra.mxu1 %v803_v13  ;;  %v232_v60 = vcvt.s32.f32 %v224_v53  ;;  %v841_v1 = vld [vmem:[%s1302_s1 + $0xe8] sm:$0xff]  ;;  %v408_v2 = vcvt.s32.f32 %v400_v57  ;;  %v409_v5 = vcvt.s32.f32 %v401_v59  ;;  %v403_v6 = vunpack.c.3.s8 %v816_v51  ;;  %v839_v12 = vld [vmem:[%s1302_s1 + $0xd8] sm:$0xff]  ;;  %30 = vst.msk [vmem:[#allocation2 + $0x18] sm:$0xff] %vm26_vm1, %v21_v42  ;;  %v22_v45 = vld [vmem:[%s1304_s2 + $0x20] sm:$0xff] }
   0xe   :  { %928 = vmatprep.subr.mxu0 %v62_v15  ;;  %954 = vmatprep.subr.mxu1 %v802_v16  ;;  %v233_v8 = vcvt.s32.f32 %v225_v61  ;;  %v404_v9 = vunpack.c.0.s8 %v817_v0  ;;  %v234_v10 = vcvt.s32.f32 %v226_v63  ;;  %v581_v11 = vunpack.c.0.s8 %v834_v4  ;;  %31 = vst.msk [vmem:[#allocation2 + $0x20] sm:$0xff] %vm26_vm1, %v22_v45 }
   0xf   :  { %929 = vmatpush3.msra.mxu0 %v62_v15  ;;  %955 = vmatpush3.msra.mxu1 %v802_v16  ;;  %v410_v13 = vcvt.s32.f32 %v402_v3  ;;  %v411_v14 = vcvt.s32.f32 %v403_v6  ;;  %v405_v15 = vunpack.c.1.s8 %v817_v0  ;;  %v838_v16 = vld [vmem:[%s1302_s1 + $0xd0] sm:$0xff]  ;;  %v406_v18 = vunpack.c.2.s8 %v817_v0 }
  0x10   :  { %930 = vmatprep.subr.mxu0 %v61_v20  ;;  %956 = vmatprep.subr.mxu1 %v801_v21  ;;  %v412_v17 = vcvt.s32.f32 %v404_v9  ;;  %v582_v19 = vunpack.c.1.s8 %v834_v4  ;;  %v407_v24 = vunpack.c.3.s8 %v817_v0  ;;  %v584_v29 = vunpack.c.3.s8 %v834_v4 }
  0x11   :  { %931 = vmatpush3.msra.mxu0 %v61_v20  ;;  %957 = vmatpush3.msra.mxu1 %v801_v21  ;;  %v589_v20 = vcvt.s32.f32 %v581_v11  ;;  %v837_v21 = vld [vmem:[%s1302_s1 + $0xc8] sm:$0xff]  ;;  %v413_v23 = vcvt.s32.f32 %v405_v15  ;;  %v414_v27 = vcvt.s32.f32 %v406_v18 }
  0x12   :  { %933 = vmatmul.mubr.msk.f32.vlgmr.msra.gmra.mxu0 %vm69_vm0, %v46_v22  ;;  %972 = vmatprep.subr.mxu0 %v825_v25  ;;  %v583_v22 = vunpack.c.2.s8 %v834_v4  ;;  %v590_v28 = vcvt.s32.f32 %v582_v19  ;;  %v415_v32 = vcvt.s32.f32 %v407_v24 }
  0x13   :  { %935 = vmatprep.mubr.msk.f32.mxu0 %vm69_vm0, %v47_v26  ;;  %973 = vmatpush3.msra.mxu0 %v825_v25  ;;  %v835_v25 = vld [vmem:[%s1303_s0 + $0x38] sm:$0xff]  ;;  %v836_v26 = vld [vmem:[%s1302_s1 + $0xc0] sm:$0xff] }
  0x14   :  { %974 = vmatprep.subr.mxu0 %v824_v30  ;;  %958 = vmatprep.subr.mxu1 %v800_v31  ;;  %v586_v34 = vunpack.c.1.s8 %v835_v25  ;;  %v588_v38 = vunpack.c.3.s8 %v835_v25  ;;  %v56_v53 = vld [vmem:[#allocation2 + $0x18] sm:$0xff] }
  0x15   :  { %975 = vmatpush3.msra.mxu0 %v824_v30  ;;  %959 = vmatpush3.msra.mxu1 %v800_v31  ;;  %v591_v30 = vcvt.s32.f32 %v583_v22  ;;  %v585_v31 = vunpack.c.0.s8 %v835_v25  ;;  %v57_v63 = vld [vmem:[#allocation2 + $0x20] sm:$0xff] }
  0x16   :  { %936 = vmatmul.mubr.msk.f32.gmra.mxu0 %vm69_vm0, %v48_v33  ;;  %976 = vmatprep.subr.mxu0 %v823_v35  ;;  %v592_v33 = vcvt.s32.f32 %v584_v29  ;;  %v596_v40 = vcvt.s32.f32 %v588_v38 }
  0x17   :  { %938 = vmatprep.mubr.msk.f32.mxu0 %vm69_vm0, %v49_v36  ;;  %960 = vmatprep.mubr.msk.f32.mxu1 %vm69_vm0, %v227_v37  ;;  %v587_v36 = vunpack.c.2.s8 %v835_v25  ;;  %v594_v37 = vcvt.s32.f32 %v586_v34 }
  0x18   :  { %977 = vmatpush3.msra.mxu0 %v823_v35  ;;  %961 = vmatmul.mubr.msk.f32.vlgmr.msra.gmra.mxu1 %vm69_vm0, %v228_v39  ;;  %v593_v35 = vcvt.s32.f32 %v585_v31 }
  0x19   :  { %978 = vmatprep.subr.mxu0 %v822_v44  ;;  %963 = vmatprep.mubr.msk.f32.mxu1 %vm69_vm0, %v229_v41  ;;  %v595_v39 = vcvt.s32.f32 %v587_v36  ;;  %v18_v41 = vld [vmem:[%s1304_s2] sm:$0xff] }
  0x1a   :  { %939 = vmatmul.mubr.msk.f32.gmra.mxu0 %vm69_vm0, %v50_v43  ;;  %1000 = vmatprep.subr.mxu1 %v843_v47  ;;  %27 = vst.msk [vmem:[#allocation2] sm:$0xff] %vm26_vm1, %v18_v41  ;;  %v20_v43 = vld [vmem:[%s1304_s2 + $0x10] sm:$0xff] }
  0x1b   :  { %979 = vmatpush3.msra.mxu0 %v822_v44  ;;  %941 = vmatprep.mubr.msk.f32.mxu0 %vm69_vm0, %v51_v46  ;;  %29 = vst.msk [vmem:[#allocation2 + $0x10] sm:$0xff] %vm26_vm1, %v20_v43  ;;  %v23_v44 = vld [vmem:[%s1304_s2 + $0x28] sm:$0xff]  ;;  %v25_v46 = vld [vmem:[%s1304_s2 + $0x38] sm:$0xff] }
  0x1c   :  { %980 = vmatprep.subr.mxu0 %v821_v50  ;;  %964 = vmatmul.mubr.msk.f32.gmra.mxu1 %vm69_vm0, %v230_v48  ;;  %32 = vst.msk [vmem:[#allocation2 + $0x28] sm:$0xff] %vm26_vm1, %v23_v44  ;;  %34 = vst.msk [vmem:[#allocation2 + $0x38] sm:$0xff] %vm26_vm1, %v25_v46  ;;  %v54_v48 = vld [vmem:[#allocation2 + $0x8] sm:$0xff] }
  0x1d   :  { %981 = vmatpush3.msra.mxu0 %v821_v50  ;;  %1001 = vmatpush3.msra.mxu1 %v843_v47  ;;  %v24_v47 = vld [vmem:[%s1304_s2 + $0x30] sm:$0xff] }
  0x1e   :  { %942 = vmatmul.mubr.msk.f32.gmra.mxu0 %vm69_vm0, %v52_v52  ;;  %982 = vmatprep.subr.mxu0 %v820_v54  ;;  %33 = vst.msk [vmem:[#allocation2 + $0x30] sm:$0xff] %vm26_vm1, %v24_v47 }
  0x1f   :  { %983 = vmatpush3.msra.mxu0 %v820_v54  ;;  %1002 = vmatprep.subr.mxu1 %v842_v55 }
  0x20   :  { %984 = vmatprep.subr.mxu0 %v819_v58  ;;  %966 = vmatprep.mubr.msk.f32.mxu1 %vm69_vm0, %v231_v56 }
  0x21   :  { %985 = vmatpush3.msra.mxu0 %v819_v58  ;;  %1003 = vmatpush3.msra.mxu1 %v842_v55  ;;  %v53_v50 = vld [vmem:[#allocation2] sm:$0xff] }
  0x22   :  { %967 = vmatmul.mubr.msk.f32.gmra.mxu1 %vm69_vm0, %v232_v60  ;;  %986 = vmatprep.subr.mxu0 %v818_v62  ;;  %v55_v56 = vld [vmem:[#allocation2 + $0x10] sm:$0xff] }
  0x23   :  { %1004 = vmatprep.subr.mxu1 %v841_v1  ;;  %987 = vmatpush3.msra.mxu0 %v818_v62  ;;  %v58_v59 = vld [vmem:[#allocation2 + $0x28] sm:$0xff]  ;;  %v60_v4 = vld [vmem:[#allocation2 + $0x38] sm:$0xff] }
  0x24   :  { %988 = vmatprep.mubr.msk.f32.mxu0 %vm69_vm0, %v408_v2  ;;  %1005 = vmatpush3.msra.mxu1 %v841_v1 }
  0x25   :  { %989 = vmatmul.mubr.msk.f32.vlgmr.msra.gmra.mxu0 %vm69_vm0, %v409_v5  ;;  %1006 = vmatprep.subr.mxu1 %v840_v7 }
  0x26   :  { %969 = vmatprep.mubr.msk.f32.mxu1 %vm69_vm0, %v233_v8  ;;  %1007 = vmatpush3.msra.mxu1 %v840_v7 }
  0x27   :  { %970 = vmatmul.mubr.msk.f32.gmra.mxu1 %vm69_vm0, %v234_v10  ;;  %1008 = vmatprep.subr.mxu1 %v839_v12  ;;  %v59_v10 = vld [vmem:[#allocation2 + $0x30] sm:$0xff] }
  0x28   :  { %991 = vmatprep.mubr.msk.f32.mxu0 %vm69_vm0, %v410_v13  ;;  %1009 = vmatpush3.msra.mxu1 %v839_v12 }
  0x29   :  { %992 = vmatmul.mubr.msk.f32.gmra.mxu0 %vm69_vm0, %v411_v14  ;;  %1010 = vmatprep.subr.mxu1 %v838_v16 }
  0x2a   :  { %1011 = vmatpush3.msra.mxu1 %v838_v16  ;;  %994 = vmatprep.mubr.msk.f32.mxu0 %vm69_vm0, %v412_v17 }
  0x2b   :  { %1012 = vmatprep.subr.mxu1 %v837_v21  ;;  %1016 = vmatprep.mubr.msk.f32.mxu1 %vm69_vm0, %v589_v20 }
  0x2c   :  { %1013 = vmatpush3.msra.mxu1 %v837_v21 }
  0x2d   :  { %995 = vmatmul.mubr.msk.f32.gmra.mxu0 %vm69_vm0, %v413_v23  ;;  %1014 = vmatprep.subr.mxu1 %v836_v26 }
  0x2e   :  { %1015 = vmatpush3.msra.mxu1 %v836_v26  ;;  %997 = vmatprep.mubr.msk.f32.mxu0 %vm69_vm0, %v414_v27 }
  0x2f   :  { %1017 = vmatmul.mubr.msk.f32.vlgmr.msra.gmra.mxu1 %vm69_vm0, %v590_v28 }
  0x30   :  { %1019 = vmatprep.mubr.msk.f32.mxu1 %vm69_vm0, %v591_v30 }
  0x31   :  { %998 = vmatmul.mubr.msk.f32.gmra.mxu0 %vm69_vm0, %v415_v32 }
  0x33   :  { %1020 = vmatmul.mubr.msk.f32.gmra.mxu1 %vm69_vm0, %v592_v33 }
  0x34   :  { %1022 = vmatprep.mubr.msk.f32.mxu1 %vm69_vm0, %v593_v35 }
  0x37   :  { %1023 = vmatmul.mubr.msk.f32.gmra.mxu1 %vm69_vm0, %v594_v37 }
  0x38   :  { %1025 = vmatprep.mubr.msk.f32.mxu1 %vm69_vm0, %v595_v39 }
  0x3b   :  { %1026 = vmatmul.mubr.msk.f32.gmra.mxu1 %vm69_vm0, %v596_v40 }
  0xd2   :  { %v934_v49 = vpop.f32.mrf.mxu0 }
  0xd3   :  { %v200_v51 = vadd.f32 %v934_v49, %v54_v48 }
  0xd4   :  { %v160_v52 = vpop.f32.mrf.mxu0 }
  0xd5   :  { %209 = vst.msk [vmem:[#allocation2 + $0x8] sm:$0xff] %vm26_vm1, %v200_v51  ;;  %v199_v54 = vadd.f32 %v160_v52, %v53_v50 }
  0xd6   :  { %v937_v55 = vpop.f32.mrf.mxu0 }
  0xd7   :  { %208 = vst.msk [vmem:[#allocation2] sm:$0xff] %vm26_vm1, %v199_v54  ;;  %v202_v57 = vadd.f32 %v937_v55, %v56_v53 }
  0xd8   :  { %v170_v58 = vpop.f32.mrf.mxu0  ;;  %v962_v60 = vpop.f32.mrf.mxu1 }
  0xd9   :  { %211 = vst.msk [vmem:[#allocation2 + $0x18] sm:$0xff] %vm26_vm1, %v202_v57  ;;  %v201_v61 = vadd.f32 %v170_v58, %v55_v56 }
  0xda   :  { %v940_v62 = vpop.f32.mrf.mxu0  ;;  %v342_v0 = vpop.f32.mrf.mxu1 }
  0xdb   :  { %210 = vst.msk [vmem:[#allocation2 + $0x10] sm:$0xff] %vm26_vm1, %v201_v61  ;;  %v204_v1 = vadd.f32 %v940_v62, %v58_v59 }
  0xdc   :  { %v236_v2 = vld [vmem:[#allocation2 + $0x8] sm:$0xff]  ;;  %v180_v3 = vpop.f32.mrf.mxu0  ;;  %v965_v5 = vpop.f32.mrf.mxu1 }
  0xdd   :  { %213 = vst.msk [vmem:[#allocation2 + $0x28] sm:$0xff] %vm26_vm1, %v204_v1  ;;  %v382_v6 = vadd.f32 %v962_v60, %v236_v2  ;;  %v203_v7 = vadd.f32 %v180_v3, %v57_v63 }
  0xde   :  { %v235_v8 = vld [vmem:[#allocation2] sm:$0xff]  ;;  %v943_v9 = vpop.f32.mrf.mxu0  ;;  %v352_v11 = vpop.f32.mrf.mxu1 }
  0xdf   :  { %390 = vst.msk [vmem:[#allocation2 + $0x8] sm:$0xff] %vm26_vm1, %v382_v6  ;;  %212 = vst.msk [vmem:[#allocation2 + $0x20] sm:$0xff] %vm26_vm1, %v203_v7  ;;  %v381_v12 = vadd.f32 %v342_v0, %v235_v8  ;;  %v206_v13 = vadd.f32 %v943_v9, %v60_v4 }
  0xe0   :  { %v238_v14 = vld [vmem:[#allocation2 + $0x18] sm:$0xff]  ;;  %v190_v15 = vpop.f32.mrf.mxu0 }
  0xe1   :  { %389 = vst.msk [vmem:[#allocation2] sm:$0xff] %vm26_vm1, %v381_v12  ;;  %215 = vst.msk [vmem:[#allocation2 + $0x38] sm:$0xff] %vm26_vm1, %v206_v13  ;;  %v384_v16 = vadd.f32 %v965_v5, %v238_v14  ;;  %v205_v17 = vadd.f32 %v190_v15, %v59_v10 }
  0xe2   :  { %v237_v18 = vld [vmem:[#allocation2 + $0x10] sm:$0xff]  ;;  %v968_v19 = vpop.f32.mrf.mxu1 }
  0xe3   :  { %392 = vst.msk [vmem:[#allocation2 + $0x18] sm:$0xff] %vm26_vm1, %v384_v16  ;;  %214 = vst.msk [vmem:[#allocation2 + $0x30] sm:$0xff] %vm26_vm1, %v205_v17  ;;  %v383_v20 = vadd.f32 %v352_v11, %v237_v18 }
  0xe4   :  { %v240_v21 = vld [vmem:[#allocation2 + $0x28] sm:$0xff]  ;;  %v362_v22 = vpop.f32.mrf.mxu1 }
  0xe5   :  { %391 = vst.msk [vmem:[#allocation2 + $0x10] sm:$0xff] %vm26_vm1, %v383_v20  ;;  %v386_v23 = vadd.f32 %v968_v19, %v240_v21  ;;  %v990_v24 = vpop.f32.mrf.mxu0 }
  0xe6   :  { %v239_v25 = vld [vmem:[#allocation2 + $0x20] sm:$0xff]  ;;  %v417_v26 = vld [vmem:[#allocation2 + $0x8] sm:$0xff] }
  0xe7   :  { %394 = vst.msk [vmem:[#allocation2 + $0x28] sm:$0xff] %vm26_vm1, %v386_v23  ;;  %v385_v27 = vadd.f32 %v362_v22, %v239_v25  ;;  %v563_v28 = vadd.f32 %v990_v24, %v417_v26  ;;  %v971_v29 = vpop.f32.mrf.mxu1  ;;  %v523_v30 = vpop.f32.mrf.mxu0 }
  0xe8   :  { %v242_v31 = vld [vmem:[#allocation2 + $0x38] sm:$0xff]  ;;  %v416_v32 = vld [vmem:[#allocation2] sm:$0xff] }
  0xe9   :  { %393 = vst.msk [vmem:[#allocation2 + $0x20] sm:$0xff] %vm26_vm1, %v385_v27  ;;  %571 = vst.msk [vmem:[#allocation2 + $0x8] sm:$0xff] %vm26_vm1, %v563_v28  ;;  %v388_v33 = vadd.f32 %v971_v29, %v242_v31  ;;  %v562_v34 = vadd.f32 %v523_v30, %v416_v32  ;;  %v993_v35 = vpop.f32.mrf.mxu0  ;;  %v372_v37 = vpop.f32.mrf.mxu1 }
  0xea   :  { %v241_v36 = vld [vmem:[#allocation2 + $0x30] sm:$0xff]  ;;  %v419_v38 = vld [vmem:[#allocation2 + $0x18] sm:$0xff] }
  0xeb   :  { %396 = vst.msk [vmem:[#allocation2 + $0x38] sm:$0xff] %vm26_vm1, %v388_v33  ;;  %570 = vst.msk [vmem:[#allocation2] sm:$0xff] %vm26_vm1, %v562_v34  ;;  %v387_v39 = vadd.f32 %v372_v37, %v241_v36  ;;  %v565_v40 = vadd.f32 %v993_v35, %v419_v38  ;;  %v533_v41 = vpop.f32.mrf.mxu0 }
  0xec   :  { %v418_v42 = vld [vmem:[#allocation2 + $0x10] sm:$0xff] }
  0xed   :  { %395 = vst.msk [vmem:[#allocation2 + $0x30] sm:$0xff] %vm26_vm1, %v387_v39  ;;  %573 = vst.msk [vmem:[#allocation2 + $0x18] sm:$0xff] %vm26_vm1, %v565_v40  ;;  %v564_v43 = vadd.f32 %v533_v41, %v418_v42  ;;  %v996_v44 = vpop.f32.mrf.mxu0 }
  0xee   :  { %v421_v45 = vld [vmem:[#allocation2 + $0x28] sm:$0xff] }
  0xef   :  { %572 = vst.msk [vmem:[#allocation2 + $0x10] sm:$0xff] %vm26_vm1, %v564_v43  ;;  %v567_v46 = vadd.f32 %v996_v44, %v421_v45  ;;  %v543_v47 = vpop.f32.mrf.mxu0  ;;  %v1018_v48 = vpop.f32.mrf.mxu1 }
  0xf0   :  { %v420_v49 = vld [vmem:[#allocation2 + $0x20] sm:$0xff]  ;;  %v598_v50 = vld [vmem:[#allocation2 + $0x8] sm:$0xff] }
  0xf1   :  { %575 = vst.msk [vmem:[#allocation2 + $0x28] sm:$0xff] %vm26_vm1, %v567_v46  ;;  %v566_v51 = vadd.f32 %v543_v47, %v420_v49  ;;  %v744_v52 = vadd.f32 %v1018_v48, %v598_v50  ;;  %v999_v53 = vpop.f32.mrf.mxu0  ;;  %v704_v54 = vpop.f32.mrf.mxu1 }
  0xf2   :  { %v423_v55 = vld [vmem:[#allocation2 + $0x38] sm:$0xff]  ;;  %v597_v56 = vld [vmem:[#allocation2] sm:$0xff] }
  0xf3   :  { %574 = vst.msk [vmem:[#allocation2 + $0x20] sm:$0xff] %vm26_vm1, %v566_v51  ;;  %752 = vst.msk [vmem:[#allocation2 + $0x8] sm:$0xff] %vm26_vm1, %v744_v52  ;;  %v569_v57 = vadd.f32 %v999_v53, %v423_v55  ;;  %v743_v58 = vadd.f32 %v704_v54, %v597_v56  ;;  %v1021_v59 = vpop.f32.mrf.mxu1  ;;  %v553_v61 = vpop.f32.mrf.mxu0 }
  0xf4   :  { %v422_v60 = vld [vmem:[#allocation2 + $0x30] sm:$0xff]  ;;  %v600_v62 = vld [vmem:[#allocation2 + $0x18] sm:$0xff] }
  0xf5   :  { %577 = vst.msk [vmem:[#allocation2 + $0x38] sm:$0xff] %vm26_vm1, %v569_v57  ;;  %751 = vst.msk [vmem:[#allocation2] sm:$0xff] %vm26_vm1, %v743_v58  ;;  %v568_v63 = vadd.f32 %v553_v61, %v422_v60  ;;  %v746_v0 = vadd.f32 %v1021_v59, %v600_v62  ;;  %v714_v1 = vpop.f32.mrf.mxu1 }
  0xf6   :  { %v599_v2 = vld [vmem:[#allocation2 + $0x10] sm:$0xff] }
  0xf7   :  { %576 = vst.msk [vmem:[#allocation2 + $0x30] sm:$0xff] %vm26_vm1, %v568_v63  ;;  %754 = vst.msk [vmem:[#allocation2 + $0x18] sm:$0xff] %vm26_vm1, %v746_v0  ;;  %v745_v3 = vadd.f32 %v714_v1, %v599_v2  ;;  %v1024_v4 = vpop.f32.mrf.mxu1 }
  0xf8   :  { %v602_v5 = vld [vmem:[#allocation2 + $0x28] sm:$0xff] }
  0xf9   :  { %753 = vst.msk [vmem:[#allocation2 + $0x10] sm:$0xff] %vm26_vm1, %v745_v3  ;;  %v748_v6 = vadd.f32 %v1024_v4, %v602_v5  ;;  %v724_v7 = vpop.f32.mrf.mxu1 }
  0xfa   :  { %v763_v8 = vld [vmem:[#allocation2 + $0x8] sm:$0xff]  ;;  %v601_v9 = vld [vmem:[#allocation2 + $0x20] sm:$0xff] }
  0xfb   :  { %v771_v10 = vmax.f32 %v763_v8, 0.0  ;;  %756 = vst.msk [vmem:[#allocation2 + $0x28] sm:$0xff] %vm26_vm1, %v748_v6  ;;  %v747_v11 = vadd.f32 %v724_v7, %v601_v9  ;;  %v1027_v12 = vpop.f32.mrf.mxu1 }
  0xfc   :  { %v762_v13 = vld [vmem:[#allocation2] sm:$0xff]  ;;  %v604_v14 = vld [vmem:[#allocation2 + $0x38] sm:$0xff] }
  0xfd   :  { %779 = vst.msk [vmem:[%s1305_s3 + $0x8] sm:$0xff] %vm26_vm1, %v771_v10  ;;  %v770_v15 = vmax.f32 %v762_v13, 0.0  ;;  %755 = vst.msk [vmem:[#allocation2 + $0x20] sm:$0xff] %vm26_vm1, %v747_v11  ;;  %v750_v16 = vadd.f32 %v1027_v12, %v604_v14  ;;  %v734_v19 = vpop.f32.mrf.mxu1 }
  0xfe   :  { %v765_v17 = vld [vmem:[#allocation2 + $0x18] sm:$0xff]  ;;  %v603_v18 = vld [vmem:[#allocation2 + $0x30] sm:$0xff] }
  0xff   :  { %778 = vst.msk [vmem:[%s1305_s3] sm:$0xff] %vm26_vm1, %v770_v15  ;;  %v773_v20 = vmax.f32 %v765_v17, 0.0  ;;  %758 = vst.msk [vmem:[#allocation2 + $0x38] sm:$0xff] %vm26_vm1, %v750_v16  ;;  %v749_v21 = vadd.f32 %v734_v19, %v603_v18 }
 0x100   :  { %v764_v22 = vld [vmem:[#allocation2 + $0x10] sm:$0xff] }
 0x101   :  { %781 = vst.msk [vmem:[%s1305_s3 + $0x18] sm:$0xff] %vm26_vm1, %v773_v20  ;;  %v772_v23 = vmax.f32 %v764_v22, 0.0  ;;  %757 = vst.msk [vmem:[#allocation2 + $0x30] sm:$0xff] %vm26_vm1, %v749_v21 }
 0x102   :  { %v767_v24 = vld [vmem:[#allocation2 + $0x28] sm:$0xff] }
 0x103   :  { %780 = vst.msk [vmem:[%s1305_s3 + $0x10] sm:$0xff] %vm26_vm1, %v772_v23  ;;  %v775_v25 = vmax.f32 %v767_v24, 0.0 }
 0x104   :  { %v766_v26 = vld [vmem:[#allocation2 + $0x20] sm:$0xff] }
 0x105   :  { %783 = vst.msk [vmem:[%s1305_s3 + $0x28] sm:$0xff] %vm26_vm1, %v775_v25  ;;  %v774_v27 = vmax.f32 %v766_v26, 0.0 }
 0x106   :  { %v769_v28 = vld [vmem:[#allocation2 + $0x38] sm:$0xff] }
 0x107   :  { %782 = vst.msk [vmem:[%s1305_s3 + $0x20] sm:$0xff] %vm26_vm1, %v774_v27  ;;  %v777_v29 = vmax.f32 %v769_v28, 0.0 }
 0x108   :  { %v768_v30 = vld [vmem:[#allocation2 + $0x30] sm:$0xff] }
 0x109   :  { %785 = vst.msk [vmem:[%s1305_s3 + $0x38] sm:$0xff] %vm26_vm1, %v777_v29  ;;  %v776_v31 = vmax.f32 %v768_v30, 0.0 }
 0x10b   :  { %784 = vst.msk [vmem:[%s1305_s3 + $0x30] sm:$0xff] %vm26_vm1, %v776_v31 }

</bundles_post_ra>
